<compile_context>
chip_gen: v7x
topology: tpu7x:2x2x1
jax: 0.10.0
libtpu: 0.0.40
codegen_flags: <defaults>
</compile_context>

<pallas_src>
import jax
import jax.numpy as jnp
from jax.experimental import pallas as pl
from jax.experimental.pallas import tpu as pltpu

state_size = 1
hidden_size = 64
action_size = 3

OUT_SUB = 8  # action_size padded to one full sublane group (8 rows)


def _round_up(n, m):
    return ((n + m - 1) // m) * m


def qnetwork_kernel(x_ref, w1_ref, b1_ref, w2_ref, b2_ref, w3_ref, b3_ref,
                    out_ref):
    """Transposed MLP tile: out[a, b] = (fc3 . relu . fc2 . relu . fc1)(x[b])[a]."""
    x_row = x_ref[0]                                              # [1, TB] f32

    # fc1: K = 1 -> VPU broadcast outer product, no MXU pass.
    h1 = jnp.maximum(w1_ref[...] * x_row + b1_ref[...], 0.0)      # [H, TB]

    # fc2 / fc3 on the MXU, f32 accumulation. Bias add / ReLU on the VPU.
    h2 = jnp.dot(w2_ref[...], h1, preferred_element_type=jnp.float32)
    h2 = jnp.maximum(h2 + b2_ref[...], 0.0)                       # [H, TB]

    q = jnp.dot(w3_ref[...], h2, preferred_element_type=jnp.float32)  # [8, TB]
    out_ref[...] = q + b3_ref[...]                                # lane-dense store


def _choose_tile(batch, tb_max):
    """Pick a lane-aligned (multiple of 128) batch tile <= tb_max."""
    padded128 = _round_up(max(batch, 1), 128)
    tile = min(_round_up(max(tb_max, 128), 128), padded128)
    # Prefer >= ~4 grid steps when the batch allows it: two steps per
    # TensorCore on v7x, and enough steps for double-buffer overlap on v5e/v6e.
    if padded128 >= 4 * 128 and padded128 < 4 * tile:
        tile = max(128, _round_up(padded128 // 4, 128))
    return tile


def qnetwork_forward(x, params, *, tb=1024):
    """x: [batch, state_size] f32 -> [batch, action_size] f32."""
    assert x.shape[1] == state_size == 1
    w1, b1, w2, b2, w3, b3 = params  # weights stored [in, out], biases [1, out]
    batch = x.shape[0]

    # Transposed resident parameters: [out, in] weights, [out, 1] column biases.
    w1_c = w1.T                                                    # [H, 1]
    b1_c = b1.T                                                    # [H, 1]
    w2_t = w2.T                                                    # [H, H]
    b2_c = b2.T                                                    # [H, 1]
    w3_t = jnp.pad(w3.T, ((0, OUT_SUB - action_size), (0, 0)))     # [8, H] (zero rows)
    b3_c = jnp.pad(b3.T, ((0, OUT_SUB - action_size), (0, 0)))     # [8, 1]

    tile = _choose_tile(batch, tb)
    padded = _round_up(batch, tile)
    n_tiles = padded // tile

    # Lane-dense state stream: (n_tiles, 1, TB), batch on the last (lane) axis.
    xs = x[:, 0]
    if padded != batch:
        xs = jnp.pad(xs, (0, padded - batch))
    xs = xs.reshape(n_tiles, 1, tile)

    const2 = lambda i: (0, 0)  # weights/biases: same block every step -> resident

    out = pl.pallas_call(
        qnetwork_kernel,
        out_shape=jax.ShapeDtypeStruct((OUT_SUB, padded), jnp.float32),
        grid=(n_tiles,),
        in_specs=[
            pl.BlockSpec((1, 1, tile), lambda i: (i, 0, 0)),       # x (streamed)
            pl.BlockSpec((hidden_size, 1), const2),                # w1  [H, 1]
            pl.BlockSpec((hidden_size, 1), const2),                # b1  [H, 1]
            pl.BlockSpec((hidden_size, hidden_size), const2),      # w2^T [H, H]
            pl.BlockSpec((hidden_size, 1), const2),                # b2  [H, 1]
            pl.BlockSpec((OUT_SUB, hidden_size), const2),          # w3^T [8, H]
            pl.BlockSpec((OUT_SUB, 1), const2),                    # b3  [8, 1]
        ],
        out_specs=pl.BlockSpec((OUT_SUB, tile), lambda i: (0, i)),
        compiler_params=pltpu.CompilerParams(
            dimension_semantics=("parallel",)),
        # TODO(synk): if xprof still shows exposed output DMA at large batch,
        # add pipeline_mode=pl.Buffered(3) on the x / out BlockSpecs.
    )(xs, w1_c, b1_c, w2_t, b2_c, w3_t, b3_c)

    # [8, padded] -> [batch, action_size]; the padded rows/cols are exact zeros
    # resp. garbage from zero-padded states, both sliced off here (tiny pass).
    return out[:action_size, :batch].T


def init_params(key):
    """Deterministic parameter init (uniform, fan-in scaled like nn.Linear)."""
    keys = jax.random.split(key, 6)

    def linear(kw, kb, fan_in, fan_out):
        bound = 1.0 / jnp.sqrt(jnp.float32(fan_in))
        # stored as [in, out] so the reference computes x @ W
        w = jax.random.uniform(kw, (fan_in, fan_out), jnp.float32,
                               minval=-bound, maxval=bound)
        b = jax.random.uniform(kb, (1, fan_out), jnp.float32,
                               minval=-bound, maxval=bound)
        return w, b

    w1, b1 = linear(keys[0], keys[1], state_size, hidden_size)
    w2, b2 = linear(keys[2], keys[3], hidden_size, hidden_size)
    w3, b3 = linear(keys[4], keys[5], hidden_size, action_size)
    return (w1, b1, w2, b2, w3, b3)


def reference_forward(x, params):
    """Plain-JAX reference matching torch semantics (all f32)."""
    w1, b1, w2, b2, w3, b3 = params
    h1 = jnp.maximum(x @ w1 + b1, 0.0)
    h2 = jnp.maximum(h1 @ w2 + b2, 0.0)
    return h2 @ w3 + b3


if __name__ == "__main__":
    key = jax.random.PRNGKey(0)
    pkey, xkey1, xkey2, xkey3 = jax.random.split(key, 4)
    params = init_params(pkey)

    # Small batch: single grid step.
    x_small = jax.random.normal(xkey1, (8, state_size), jnp.float32)
    out_small = jax.block_until_ready(qnetwork_forward(x_small, params))
    ref_small = reference_forward(x_small, params)
    assert out_small.shape == (8, action_size)
    assert jnp.allclose(out_small, ref_small, atol=2e-5, rtol=2e-5)

    # Batch not a multiple of the tile: exercises padding + multi-step grid.
    x_mid = jax.random.normal(xkey2, (300, state_size), jnp.float32)
    out_mid = jax.block_until_ready(qnetwork_forward(x_mid, params, tb=256))
    assert out_mid.shape == (300, action_size)
    assert jnp.allclose(out_mid, reference_forward(x_mid, params),
                        atol=2e-5, rtol=2e-5)

    # Batch large enough to trigger the >=4-grid-step heuristic at default tb.
    x_big = jax.random.normal(xkey3, (1024, state_size), jnp.float32)
    out_big = jax.block_until_ready(qnetwork_forward(x_big, params))
    assert out_big.shape == (1024, action_size)
    assert jnp.allclose(out_big, reference_forward(x_big, params),
                        atol=2e-5, rtol=2e-5)

    print("KERNEL_OK")
</pallas_src>

<mosaic_0001>
module attributes {stable_mosaic.version = 11 : i64} {
  func.func @qnetwork_kernel(%arg0: i32, %arg1: memref<1x1x128xf32, #tpu.memory_space<vmem>>, %arg2: memref<64x1xf32, #tpu.memory_space<vmem>>, %arg3: memref<64x1xf32, #tpu.memory_space<vmem>>, %arg4: memref<64x64xf32, #tpu.memory_space<vmem>>, %arg5: memref<64x1xf32, #tpu.memory_space<vmem>>, %arg6: memref<8x64xf32, #tpu.memory_space<vmem>>, %arg7: memref<8x1xf32, #tpu.memory_space<vmem>>, %arg8: memref<8x128xf32, #tpu.memory_space<vmem>>) attributes {dimension_semantics = [#tpu.dimension_semantics<parallel>], iteration_bounds = array<i64: 1>, scalar_prefetch = 0 : i64, scratch_operands = 0 : i64, tpu.core_type = #tpu.core_type<tc>, window_params = [{transform_indices = @transform_0, window_bounds = array<i64: 1, 1, 128>}, {pipeline_mode = #tpu.pipeline_mode<synchronous>, transform_indices = @transform_1, window_bounds = array<i64: 64, 1>}, {pipeline_mode = #tpu.pipeline_mode<synchronous>, transform_indices = @transform_2, window_bounds = array<i64: 64, 1>}, {pipeline_mode = #tpu.pipeline_mode<synchronous>, transform_indices = @transform_3, window_bounds = array<i64: 64, 64>}, {pipeline_mode = #tpu.pipeline_mode<synchronous>, transform_indices = @transform_4, window_bounds = array<i64: 64, 1>}, {pipeline_mode = #tpu.pipeline_mode<synchronous>, transform_indices = @transform_5, window_bounds = array<i64: 8, 64>}, {pipeline_mode = #tpu.pipeline_mode<synchronous>, transform_indices = @transform_6, window_bounds = array<i64: 8, 1>}, {transform_indices = @transform_7, window_bounds = array<i64: 8, 128>}]} {
    %c0 = arith.constant 0 : index
    %c0_0 = arith.constant 0 : index
    %c0_1 = arith.constant 0 : index
    %0 = vector.load %arg1[%c0, %c0_0, %c0_1] : memref<1x1x128xf32, #tpu.memory_space<vmem>>, vector<1x1x128xf32>
    %1 = vector.shape_cast %0 : vector<1x1x128xf32> to vector<1x128xf32>
    %c0_2 = arith.constant 0 : index
    %c0_3 = arith.constant 0 : index
    %2 = vector.load %arg2[%c0_2, %c0_3] : memref<64x1xf32, #tpu.memory_space<vmem>>, vector<64x1xf32>
    %3 = vector.broadcast %2 : vector<64x1xf32> to vector<64x128xf32>
    %4 = vector.broadcast %1 : vector<1x128xf32> to vector<64x128xf32>
    %5 = arith.mulf %3, %4 : vector<64x128xf32>
    %c0_4 = arith.constant 0 : index
    %c0_5 = arith.constant 0 : index
    %6 = vector.load %arg3[%c0_4, %c0_5] : memref<64x1xf32, #tpu.memory_space<vmem>>, vector<64x1xf32>
    %7 = vector.broadcast %6 : vector<64x1xf32> to vector<64x128xf32>
    %8 = arith.addf %5, %7 : vector<64x128xf32>
    %cst = arith.constant 0.000000e+00 : f32
    %9 = vector.broadcast %cst : f32 to vector<64x128xf32>
    %10 = arith.maximumf %8, %9 : vector<64x128xf32>
    %c0_6 = arith.constant 0 : index
    %c0_7 = arith.constant 0 : index
    %11 = vector.load %arg4[%c0_6, %c0_7] : memref<64x64xf32, #tpu.memory_space<vmem>>, vector<64x64xf32>
    %cst_8 = arith.constant dense<0.000000e+00> : vector<64x128xf32>
    %12 = tpu.matmul %11, %10, %cst_8 {dimension_numbers = #tpu.dot_dimension_numbers<[1], [0], [0], [1], [0, 0, 1, 1], [], []>} : vector<64x64xf32>, vector<64x128xf32>, vector<64x128xf32> -> vector<64x128xf32>
    %c0_9 = arith.constant 0 : index
    %c0_10 = arith.constant 0 : index
    %13 = vector.load %arg5[%c0_9, %c0_10] : memref<64x1xf32, #tpu.memory_space<vmem>>, vector<64x1xf32>
    %14 = vector.broadcast %13 : vector<64x1xf32> to vector<64x128xf32>
    %15 = arith.addf %12, %14 : vector<64x128xf32>
    %cst_11 = arith.constant 0.000000e+00 : f32
    %16 = vector.broadcast %cst_11 : f32 to vector<64x128xf32>
    %17 = arith.maximumf %15, %16 : vector<64x128xf32>
    %c0_12 = arith.constant 0 : index
    %c0_13 = arith.constant 0 : index
    %18 = vector.load %arg6[%c0_12, %c0_13] : memref<8x64xf32, #tpu.memory_space<vmem>>, vector<8x64xf32>
    %cst_14 = arith.constant dense<0.000000e+00> : vector<8x128xf32>
    %19 = tpu.matmul %18, %17, %cst_14 {dimension_numbers = #tpu.dot_dimension_numbers<[1], [0], [0], [1], [0, 0, 1, 1], [], []>} : vector<8x64xf32>, vector<64x128xf32>, vector<8x128xf32> -> vector<8x128xf32>
    %c0_15 = arith.constant 0 : index
    %c0_16 = arith.constant 0 : index
    %20 = vector.load %arg7[%c0_15, %c0_16] : memref<8x1xf32, #tpu.memory_space<vmem>>, vector<8x1xf32>
    %21 = vector.broadcast %20 : vector<8x1xf32> to vector<8x128xf32>
    %22 = arith.addf %19, %21 : vector<8x128xf32>
    %c0_17 = arith.constant 0 : index
    %c0_18 = arith.constant 0 : index
    %23 = vector.load %arg8[%c0_17, %c0_18] : memref<8x128xf32, #tpu.memory_space<vmem>>, vector<8x128xf32>
    tpu.vector_store %arg8[%c0_17, %c0_18], %22 {strides = array<i32>} : memref<8x128xf32, #tpu.memory_space<vmem>>, vector<8x128xf32>,
    return
  }
  func.func @transform_0(%arg0: i32) -> (i32, i32, i32) {
    %c0_i32 = arith.constant 0 : i32
    %c0_i32_0 = arith.constant 0 : i32
    %c0_i32_1 = arith.constant 0 : i32
    return %arg0, %c0_i32, %c0_i32_0 : i32, i32, i32
  }
  func.func @transform_1(%arg0: i32) -> (i32, i32) {
    %c0_i32 = arith.constant 0 : i32
    %c0_i32_0 = arith.constant 0 : i32
    %c0_i32_1 = arith.constant 0 : i32
    return %c0_i32, %c0_i32_0 : i32, i32
  }
  func.func @transform_2(%arg0: i32) -> (i32, i32) {
    %c0_i32 = arith.constant 0 : i32
    %c0_i32_0 = arith.constant 0 : i32
    %c0_i32_1 = arith.constant 0 : i32
    return %c0_i32, %c0_i32_0 : i32, i32
  }
  func.func @transform_3(%arg0: i32) -> (i32, i32) {
    %c0_i32 = arith.constant 0 : i32
    %c0_i32_0 = arith.constant 0 : i32
    %c0_i32_1 = arith.constant 0 : i32
    return %c0_i32, %c0_i32_0 : i32, i32
  }
  func.func @transform_4(%arg0: i32) -> (i32, i32) {
    %c0_i32 = arith.constant 0 : i32
    %c0_i32_0 = arith.constant 0 : i32
    %c0_i32_1 = arith.constant 0 : i32
    return %c0_i32, %c0_i32_0 : i32, i32
  }
  func.func @transform_5(%arg0: i32) -> (i32, i32) {
    %c0_i32 = arith.constant 0 : i32
    %c0_i32_0 = arith.constant 0 : i32
    %c0_i32_1 = arith.constant 0 : i32
    return %c0_i32, %c0_i32_0 : i32, i32
  }
  func.func @transform_6(%arg0: i32) -> (i32, i32) {
    %c0_i32 = arith.constant 0 : i32
    %c0_i32_0 = arith.constant 0 : i32
    %c0_i32_1 = arith.constant 0 : i32
    return %c0_i32, %c0_i32_0 : i32, i32
  }
  func.func @transform_7(%arg0: i32) -> (i32, i32) {
    %c0_i32 = arith.constant 0 : i32
    %c0_i32_0 = arith.constant 0 : i32
    return %c0_i32, %arg0 : i32, i32
  }
}

</mosaic_0001>

<bundles_post_ra>
// kernel: tpu_custom_call.1
= control target key start
LH: loop header
LB: loop body
LE: loop exit
PB: predicated region body
PF: predicated region fallthrough
CT: control target
= control target key end

     0   :  { %v584_v2 = vmov 0   ;;  %s755_s0 = inlined_call_operand.vmem [shape: f32[1,1,128], index: 0, kind: input, shape index: {}]   ;;  %s756_s1 = inlined_call_operand.vmem [shape: f32[64,1], index: 1, kind: input, shape index: {}]   ;;  %s757_s2 = inlined_call_operand.vmem [shape: f32[64,1], index: 2, kind: input, shape index: {}]   ;;  %s758_s3 = inlined_call_operand.vmem [shape: f32[64,64], index: 3, kind: input, shape index: {}]   ;;  %s759_s4 = inlined_call_operand.vmem [shape: f32[64,1], index: 4, kind: input, shape index: {}]   ;;  %s760_s5 = inlined_call_operand.vmem [shape: f32[8,64], index: 5, kind: input, shape index: {}]   ;;  %s761_s6 = inlined_call_operand.vmem [shape: f32[8,1], index: 6, kind: input, shape index: {}]   ;;  %s762_s7 = inlined_call_operand.hbm [shape: f32[8,128], index: 7, kind: output, shape index: {}]  }
   0x1   :  { %v90_v0 = vld [vmem:[%s757_s2] sm:$0xff]  ;;  %559 = vset.pattern.permute.xlu1 %v584_v2  ;;  %558 = vset.pattern.permute.xlu0 %v584_v2  ;;  %v91_v3 = vld [vmem:[%s757_s2 + $0x8] sm:$0xff]  ;;  %v31_v5 = vld [vmem:[%s756_s1 + $0x18] sm:$0xff] }
   0x2   :  { %v28_v1 = vld [vmem:[%s756_s1] sm:$0xff]  ;;  %100 = vperm.xlu1 %559, %v90_v0   ;;  %v29_v4 = vld [vmem:[%s756_s1 + $0x8] sm:$0xff]  ;;  %v30_v6 = vld [vmem:[%s756_s1 + $0x10] sm:$0xff] }
   0x3   :  { %38 = vperm.xlu0 %558, %v28_v1  }
   0x6   :  { %105 = vperm.xlu1 %559, %v91_v3  }
   0x7   :  { %43 = vperm.xlu0 %558, %v29_v4  }
   0x8   :  { %12 = vsyncpa [#allocation3], 0  ;;  %v93_v7 = vld [vmem:[%s757_s2 + $0x18] sm:$0xff]  ;;  %v92_v8 = vld [vmem:[%s757_s2 + $0x10] sm:$0xff]  ;;  %vm210_vm0 = vcmask 523264   ;;  %vm586_vm1 = vmmov 0  }
   0x9   :  { %v33_v9 = vld [vmem:[%s756_s1 + $0x28] sm:$0xff]  ;;  %v32_v10 = vld [vmem:[%s756_s1 + $0x20] sm:$0xff]  ;;  %v35_v13 = vld [vmem:[%s756_s1 + $0x38] sm:$0xff]  ;;  %s588_s17 = smov [#allocation2]  }
   0xa   :  { %53 = vperm.xlu1 %559, %v31_v5   ;;  %v95_v11 = vld [vmem:[%s757_s2 + $0x28] sm:$0xff]  ;;  %v94_v12 = vld [vmem:[%s757_s2 + $0x20] sm:$0xff]  ;;  %v34_v14 = vld [vmem:[%s756_s1 + $0x30] sm:$0xff]  ;;  %s435_s18 = sshll.u32 %s588_s17, 4  ;;  %s436_s18 = int_to_ptr.vmem [resolvable:$true] %s435_s18 }
   0xb   :  { %48 = vperm.xlu0 %558, %v30_v6   ;;  %v97_v15 = vld [vmem:[%s757_s2 + $0x38] sm:$0xff]  ;;  %v96_v16 = vld [vmem:[%s757_s2 + $0x30] sm:$0xff]  ;;  %v163_v17 = vld [vmem:[%s759_s4 + $0x8] sm:$0xff]  ;;  %s560_s19 = scalar_lea.vmem %s436_s18, 128  ;;  %p565_p1 = scmp.lt.s32.totalorder %s436_s18, %s436_s18 }
   0xc   :  { %v162_v18 = vld [vmem:[%s759_s4] sm:$0xff]  ;;  %v165_v19 = vld [vmem:[%s759_s4 + $0x18] sm:$0xff]  ;;  %v164_v20 = vld [vmem:[%s759_s4 + $0x10] sm:$0xff]  ;;  %p561_p0 = scmp.ne.s32.totalorder %s436_s18, %s560_s19  ;;  %p566_p2 = scmp.lt.s32.totalorder %s560_s19, %s560_s19 }
   0xd   :  { %v154_v21 = vld [vmem:[%s758_s3] sm:$0xff]  ;;  %v167_v22 = vld [vmem:[%s759_s4 + $0x28] sm:$0xff]  ;;  %v169_v24 = vld [vmem:[%s759_s4 + $0x38] sm:$0xff] }
   0xe   :  { %115 = vperm.xlu1 %559, %v93_v7   ;;  %v166_v23 = vld [vmem:[%s759_s4 + $0x20] sm:$0xff]  ;;  %494 = vmatprep.mubr.msk.f32.mxu0 %vm210_vm0, %v154_v21  ;;  %v168_v25 = vld [vmem:[%s759_s4 + $0x30] sm:$0xff]  ;;  %p567_p3 = por %p566_p2, %p565_p1 }
   0xf   :  { %110 = vperm.xlu0 %558, %v92_v8   ;;  %v349_v26 = vld [vmem:[%s761_s6] sm:$0xff]  ;;  %v155_v8 = vld [vmem:[%s758_s3 + $0x8] sm:$0xff] }
  0x10   :  { %v443_v27 = vld [vmem:[%s755_s0] ss:$0 sm:$0xff]  ;;  %p568_p4 = pnand %p567_p3, %p561_p0 }
  0x12   :  { %63 = vperm.xlu1 %559, %v33_v9   ;;  %v156_v9 = vld [vmem:[%s758_s3 + $0x10] sm:$0xff] }
  0x13   :  { %58 = vperm.xlu0 %558, %v32_v10   ;;  %v157_v10 = vld [vmem:[%s758_s3 + $0x18] sm:$0xff] }
  0x16   :  { %125 = vperm.xlu1 %559, %v95_v11   ;;  %v158_v11 = vld [vmem:[%s758_s3 + $0x20] sm:$0xff] }
  0x17   :  { %120 = vperm.xlu0 %558, %v94_v12   ;;  %v159_v12 = vld [vmem:[%s758_s3 + $0x28] sm:$0xff] }
  0x1a   :  { %73 = vperm.xlu1 %559, %v35_v13   ;;  %v160_v13 = vld [vmem:[%s758_s3 + $0x30] sm:$0xff] }
  0x1b   :  { %68 = vperm.xlu0 %558, %v34_v14   ;;  %v161_v14 = vld [vmem:[%s758_s3 + $0x38] sm:$0xff] }
  0x1e   :  { %135 = vperm.xlu1 %559, %v97_v15   ;;  %v585_v15 = vmov 0.0|0.0  }
  0x1f   :  { %130 = vperm.xlu0 %558, %v96_v16   ;;  %541 = vmatprep.subr.bf16.mxu1 %v585_v15  ;;  %v587_v16 = vmov 0.0  }
  0x20   :  { %522 = vmatprep.mubr.msk.f32.mxu1 %vm586_vm1, %v587_v16 }
  0x22   :  { %177 = vperm.xlu1 %559, %v163_v17  }
  0x23   :  { %172 = vperm.xlu0 %558, %v162_v18  }
  0x26   :  { %187 = vperm.xlu1 %559, %v165_v19  }
  0x27   :  { %182 = vperm.xlu0 %558, %v164_v20  }
  0x2a   :  { %197 = vperm.xlu1 %559, %v167_v22  }
  0x2b   :  { %192 = vperm.xlu0 %558, %v166_v23  }
  0x2e   :  { %207 = vperm.xlu1 %559, %v169_v24  }
  0x2f   :  { %202 = vperm.xlu0 %558, %v168_v25  }
  0x33   :  { %352 = vperm.xlu0 %558, %v349_v26  }
  0x81   :  { %v101_v28 = vpop.permute.xlu1 %100 }
  0x82   :  { %v39_v29 = vpop.permute.xlu0 %38 }
  0x83   :  { %v82_v30 = vmul.f32 %v443_v27, %v39_v29 }
  0x85   :  { %v106_v31 = vpop.permute.xlu1 %105  ;;  %v138_v33 = vadd.f32 %v101_v28, %v82_v30 }
  0x86   :  { %v44_v32 = vpop.permute.xlu0 %43 }
  0x87   :  { %v83_v34 = vmul.f32 %v443_v27, %v44_v32  ;;  %v146_v38 = vmax.f32 %v138_v33, 0.0 }
  0x89   :  { %v139_v35 = vadd.f32 %v106_v31, %v83_v34  ;;  %v54_v36 = vpop.permute.xlu1 %53 }
  0x8a   :  { %v49_v37 = vpop.permute.xlu0 %48  ;;  %v85_v40 = vmul.f32 %v443_v27, %v54_v36 }
  0x8b   :  { %v147_v39 = vmax.f32 %v139_v35, 0.0  ;;  %v84_v41 = vmul.f32 %v443_v27, %v49_v37 }
  0x8d   :  { %v525_v42 = vpack.c.bf16 %v147_v39, %v146_v38  ;;  %v116_v43 = vpop.permute.xlu1 %115 }
  0x8e   :  { %v111_v44 = vpop.permute.xlu0 %110  ;;  %v141_v45 = vadd.f32 %v116_v43, %v85_v40 }
  0x8f   :  { %v140_v46 = vadd.f32 %v111_v44, %v84_v41  ;;  %526 = vmatprep.subr.bf16.mxu0 %v525_v42 }
  0x90   :  { %528 = vmatpush3.bf16.msra.mxu0 %v525_v42  ;;  %v149_v47 = vmax.f32 %v141_v45, 0.0 }
  0x91   :  { %v148_v48 = vmax.f32 %v140_v46, 0.0  ;;  %v64_v49 = vpop.permute.xlu1 %63 }
  0x92   :  { %v59_v50 = vpop.permute.xlu0 %58  ;;  %v87_v52 = vmul.f32 %v443_v27, %v64_v49 }
  0x93   :  { %v529_v51 = vpack.c.bf16 %v149_v47, %v148_v48  ;;  %v86_v53 = vmul.f32 %v443_v27, %v59_v50 }
  0x95   :  { %530 = vmatprep.subr.bf16.mxu0 %v529_v51  ;;  %v126_v54 = vpop.permute.xlu1 %125 }
  0x96   :  { %v121_v55 = vpop.permute.xlu0 %120  ;;  %532 = vmatpush3.bf16.msra.mxu0 %v529_v51  ;;  %v143_v56 = vadd.f32 %v126_v54, %v87_v52 }
  0x97   :  { %v142_v57 = vadd.f32 %v121_v55, %v86_v53  ;;  %v348_v53 = vld [vmem:[%s760_s5] sm:$0xff] }
  0x98   :  { %v151_v58 = vmax.f32 %v143_v56, 0.0 }
  0x99   :  { %v150_v59 = vmax.f32 %v142_v57, 0.0  ;;  %v74_v60 = vpop.permute.xlu1 %73 }
  0x9a   :  { %v69_v61 = vpop.permute.xlu0 %68  ;;  %v89_v63 = vmul.f32 %v443_v27, %v74_v60 }
  0x9b   :  { %v533_v62 = vpack.c.bf16 %v151_v58, %v150_v59  ;;  %v88_v0 = vmul.f32 %v443_v27, %v69_v61 }
  0x9d   :  { %534 = vmatprep.subr.bf16.mxu0 %v533_v62  ;;  %v136_v1 = vpop.permute.xlu1 %135 }
  0x9e   :  { %v131_v2 = vpop.permute.xlu0 %130  ;;  %536 = vmatpush3.bf16.msra.mxu0 %v533_v62  ;;  %v145_v3 = vadd.f32 %v136_v1, %v89_v63 }
  0x9f   :  { %v144_v4 = vadd.f32 %v131_v2, %v88_v0 }
  0xa0   :  { %v153_v5 = vmax.f32 %v145_v3, 0.0 }
  0xa1   :  { %v152_v6 = vmax.f32 %v144_v4, 0.0  ;;  %v178_v17 = vpop.permute.xlu1 %177 }
  0xa2   :  { %v173_v18 = vpop.permute.xlu0 %172 }
  0xa3   :  { %v537_v7 = vpack.c.bf16 %v153_v5, %v152_v6 }
  0xa5   :  { %538 = vmatprep.subr.bf16.mxu0 %v537_v7  ;;  %v188_v19 = vpop.permute.xlu1 %187 }
  0xa6   :  { %540 = vmatpush3.bf16.msra.mxu0 %v537_v7  ;;  %v183_v21 = vpop.permute.xlu0 %182 }
  0xa9   :  { %495 = vmatmul.mubr.msk.f32.vlgmr.msra.gmra.mrb[0].mxu0 %vm210_vm0, %v155_v8  ;;  %v198_v30 = vpop.permute.xlu1 %197 }
  0xaa   :  { %497 = vmatprep.mubr.msk.f32.mxu0 %vm210_vm0, %v156_v9  ;;  %v193_v33 = vpop.permute.xlu0 %192 }
  0xad   :  { %498 = vmatmul.mubr.msk.f32.gmra.mrb[2].mxu0 %vm210_vm0, %v157_v10  ;;  %v208_v42 = vpop.permute.xlu1 %207 }
  0xae   :  { %500 = vmatprep.mubr.msk.f32.mxu0 %vm210_vm0, %v158_v11  ;;  %v203_v45 = vpop.permute.xlu0 %202 }
  0xb1   :  { %501 = vmatmul.mubr.msk.f32.gmra.mrb[4].mxu0 %vm210_vm0, %v159_v12 }
  0xb2   :  { %503 = vmatprep.mubr.msk.f32.mxu0 %vm210_vm0, %v160_v13  ;;  %v353_v54 = vpop.permute.xlu0 %352 }
  0xb5   :  { %504 = vmatmul.mubr.msk.f32.gmra.mrb[6].mxu0 %vm210_vm0, %v161_v14 }
 0x17c   :  { %v496_v20 = vpop.f32.mrb[0].mxu0 }
 0x17d   :  { %v307_v22 = vadd.f32 %v496_v20, %v178_v17  ;;  %v301_v23 = vpop.f32.mrb[1].mxu0 }
 0x17e   :  { %v302_v24 = vadd.f32 %v301_v23, %v173_v18 }
 0x17f   :  { %v341_v25 = vmax.f32 %v307_v22, 0.0 }
 0x180   :  { %v340_v26 = vmax.f32 %v302_v24, 0.0  ;;  %v499_v27 = vpop.f32.mrb[2].mxu0 }
 0x181   :  { %v317_v28 = vadd.f32 %v499_v27, %v188_v19  ;;  %v311_v29 = vpop.f32.mrb[3].mxu0 }
 0x182   :  { %v312_v31 = vadd.f32 %v311_v29, %v183_v21  ;;  %v542_v32 = vpack.c.bf16 %v341_v25, %v340_v26 }
 0x183   :  { %v343_v34 = vmax.f32 %v317_v28, 0.0 }
 0x184   :  { %v342_v35 = vmax.f32 %v312_v31, 0.0  ;;  %v502_v36 = vpop.f32.mrb[4].mxu0  ;;  %543 = vmatpush3.bf16.msra.mxu1 %v542_v32 }
 0x185   :  { %v327_v37 = vadd.f32 %v502_v36, %v198_v30  ;;  %v321_v38 = vpop.f32.mrb[5].mxu0  ;;  %544 = vmatprep.subr.bf16.mxu1 %v585_v15 }
 0x186   :  { %v545_v39 = vpack.c.bf16 %v343_v34, %v342_v35  ;;  %v322_v40 = vadd.f32 %v321_v38, %v193_v33 }
 0x187   :  { %v345_v41 = vmax.f32 %v327_v37, 0.0 }
 0x188   :  { %v344_v43 = vmax.f32 %v322_v40, 0.0  ;;  %v505_v44 = vpop.f32.mrb[6].mxu0  ;;  %546 = vmatpush3.bf16.msra.mxu1 %v545_v39 }
 0x189   :  { %v337_v46 = vadd.f32 %v505_v44, %v208_v42  ;;  %v331_v47 = vpop.f32.mrb[7].mxu0  ;;  %547 = vmatprep.subr.bf16.mxu1 %v585_v15 }
 0x18a   :  { %v548_v48 = vpack.c.bf16 %v345_v41, %v344_v43  ;;  %v332_v49 = vadd.f32 %v331_v47, %v203_v45 }
 0x18b   :  { %v347_v50 = vmax.f32 %v337_v46, 0.0 }
 0x18c   :  { %v346_v51 = vmax.f32 %v332_v49, 0.0  ;;  %549 = vmatpush3.bf16.msra.mxu1 %v548_v48 }
 0x18d   :  { %550 = vmatprep.subr.bf16.mxu1 %v585_v15 }
 0x18e   :  { %v551_v52 = vpack.c.bf16 %v347_v50, %v346_v51 }
 0x190   :  { %552 = vmatpush3.bf16.msra.mxu1 %v551_v52 }
 0x193   :  { %523 = vmatmul.mubr.msk.f32.vlgmr.msra.gmra.mrb[0].mxu1 %vm210_vm0, %v348_v53 }
 0x266   :  { %v424_v55 = vpop.f32.mrb[0].mxu1 }
 0x267   :  { %v425_v56 = vadd.f32 %v424_v55, %v353_v54  ;;  %v524_v57 = vpop.f32.mrb[1].mxu1 }
 0x269   :  { %428 = vst [vmem:[#allocation2] sm:$0xff] %v425_v56 }
 0x26a   :  { %571 = shalt.err (!%p568_p4)
}
 0x26b   :  { %s572_s5 = scalar_lea.hbm %s762_s7, 128 }
 0x26c   :  { %p573_p5 = scmp.ne.s32.totalorder %s762_s7, %s572_s5  ;;  %p576_p6 = scmp.lt.u32.totalorder %s572_s5, %s762_s7 }
 0x26e   :  { %p578_p7 = pnand %p576_p6, %p573_p5 }
 0x270   :  { %581 = shalt.err (!%p578_p7)
}
 0x271   :  { %438 = dma.vmem_to_hbm [thread:$0]  %s436_s18, 128, %s762_s7, [#allocation3]  }
 0x272   :  { %582 = dma.done.wait [#allocation3], 128  }
 0x273   :  { %583 = vsyncadd [#allocation3], 4294967168 }
 0x274   :  { %442 = vsyncpa [#allocation3], 1 }

</bundles_post_ra>
